<compile_context>
chip_gen: v5e
topology: v5e:2x2
jax: 0.10.0
libtpu: 0.0.40
codegen_flags: <defaults>
</compile_context>

<pallas_src>
import jax
import jax.numpy as jnp
from jax.experimental import pallas as pl
from jax.experimental.pallas import tpu as pltpu

FLAT = 100    # 10*10 flattened spatial size
PAD_L = 128   # lane-dense width
PAD_S = 8     # sublane-dense height (one full vreg tile)


def _fused_kernel(scal_ref, x_ref, wt_ref, o_ref):
    # scal_ref: SMEM (4,)        = [w1, b1, w2, b2]  (1x1 conv weights/biases)
    # x_ref:    VMEM (8, 128)    row 0 = flattened input (lanes 100..127 zero),
    #                            rows 1..7 zero
    # wt_ref:   VMEM (128, 128)  = pad(W.T) (contraction dim on sublanes)
    # o_ref:    VMEM (8, 128)    row 0 lanes 0..99 are the result; rest is
    #                            garbage and sliced off in the wrapper
    w1 = scal_ref[0]
    b1 = scal_ref[1]
    w2 = scal_ref[2]
    b2 = scal_ref[3]

    # conv1: 1x1 conv with a single in/out channel == scalar affine.
    x = x_ref[...] * w1 + b1                                           # (8, 128) f32

    # F.linear(x, W) = x @ W.T; W.T is pre-padded/pre-transposed in the wrapper,
    # so this is a lane-dense (8,128) @ (128,128) MXU pass, no in-kernel transpose.
    y = jnp.dot(x, wt_ref[...], preferred_element_type=jnp.float32)    # (8, 128)

    # conv2 (scalar affine) + ReLU.
    y = y * w2 + b2
    o_ref[...] = jnp.maximum(y, 0.0)


def insertion_point_test_model(input_nchw, params):
    """input_nchw: (1, 1, 10, 10) f32. Returns (1, 1, 10, 10) f32."""
    w1, b1, w2, b2 = (params["conv1_w"], params["conv1_b"],
                      params["conv2_w"], params["conv2_b"])
    W = params["linear_wts"]                                      # (100, 100)

    # Pad the flattened input to a full (8, 128) vreg tile (row 0 = data).
    x_flat = input_nchw.reshape(1, -1).astype(jnp.float32)        # (1, 100)
    x_pad = jnp.zeros((PAD_S, PAD_L), jnp.float32).at[0, :FLAT].set(x_flat[0])

    # Pre-transpose + zero-pad the linear weight once, outside the kernel.
    wt_pad = jnp.zeros((PAD_L, PAD_L), jnp.float32).at[:FLAT, :FLAT].set(
        W.astype(jnp.float32).T)

    scalars = jnp.stack([w1, b1, w2, b2]).astype(jnp.float32)     # (4,)

    out_pad = pl.pallas_call(
        _fused_kernel,
        out_shape=jax.ShapeDtypeStruct((PAD_S, PAD_L), jnp.float32),
        in_specs=[
            pl.BlockSpec(memory_space=pltpu.MemorySpace.SMEM),
            pl.BlockSpec(memory_space=pltpu.MemorySpace.VMEM),
            pl.BlockSpec(memory_space=pltpu.MemorySpace.VMEM),
        ],
        out_specs=pl.BlockSpec(memory_space=pltpu.MemorySpace.VMEM),
    )(scalars, x_pad, wt_pad)

    return out_pad[0, :FLAT].reshape(1, 1, 10, 10)


def _reference(input_nchw, params):
    """Plain-JAX reference of the PyTorch forward."""
    x = input_nchw * params["conv1_w"] + params["conv1_b"]
    x = x.reshape(-1)                              # (100,)
    x = params["linear_wts"] @ x                   # F.linear(x, W) = W @ x
    x = x.reshape(1, 1, 10, 10)
    x = x * params["conv2_w"] + params["conv2_b"]
    return jnp.maximum(x, 0.0)


if __name__ == "__main__":
    key = jax.random.PRNGKey(0)
    k_in, k_w, k_c1w, k_c1b, k_c2w, k_c2b = jax.random.split(key, 6)

    # Deterministic synthetic parameters (shapes from the module __init__).
    params = {
        "conv1_w": jax.random.normal(k_c1w, ()) * 0.5,           # Conv2d(1,1,1,1) weight (scalar)
        "conv1_b": jax.random.normal(k_c1b, ()) * 0.1,           # bias
        "conv2_w": jax.random.normal(k_c2w, ()) * 0.5,
        "conv2_b": jax.random.normal(k_c2b, ()) * 0.1,
        "linear_wts": jax.random.normal(k_w, (100, 100)) * 0.1,  # nn.Parameter (100, 100)
    }

    # Input must flatten to 100 elements: NCHW (1, 1, 10, 10).
    x = jax.random.normal(k_in, (1, 1, 10, 10), dtype=jnp.float32)

    out = insertion_point_test_model(x, params)
    out = jax.block_until_ready(out)

    ref = _reference(x, params)
    assert out.shape == (1, 1, 10, 10)
    assert jnp.allclose(out, ref, atol=1e-4, rtol=1e-4), "mismatch vs reference"

    print("KERNEL_OK")
</pallas_src>

<mosaic_0001>
module attributes {stable_mosaic.version = 11 : i64} {
  func.func @_fused_kernel(%arg0: memref<4xf32, #tpu.memory_space<smem>>, %arg1: memref<8x128xf32, #tpu.memory_space<vmem>>, %arg2: memref<128x128xf32, #tpu.memory_space<vmem>>, %arg3: memref<8x128xf32, #tpu.memory_space<vmem>>) attributes {dimension_semantics = [], scalar_prefetch = 0 : i64, scratch_operands = 0 : i64, tpu.core_type = #tpu.core_type<tc>} {
    %c0 = arith.constant 0 : index
    %0 = memref.load %arg0[%c0] : memref<4xf32, #tpu.memory_space<smem>>
    %c1 = arith.constant 1 : index
    %1 = memref.load %arg0[%c1] : memref<4xf32, #tpu.memory_space<smem>>
    %c2 = arith.constant 2 : index
    %2 = memref.load %arg0[%c2] : memref<4xf32, #tpu.memory_space<smem>>
    %c3 = arith.constant 3 : index
    %3 = memref.load %arg0[%c3] : memref<4xf32, #tpu.memory_space<smem>>
    %c0_0 = arith.constant 0 : index
    %c0_1 = arith.constant 0 : index
    %4 = vector.load %arg1[%c0_0, %c0_1] : memref<8x128xf32, #tpu.memory_space<vmem>>, vector<8x128xf32>
    %5 = vector.broadcast %0 : f32 to vector<8x128xf32>
    %6 = arith.mulf %4, %5 : vector<8x128xf32>
    %7 = vector.broadcast %1 : f32 to vector<8x128xf32>
    %8 = arith.addf %6, %7 : vector<8x128xf32>
    %c0_2 = arith.constant 0 : index
    %c0_3 = arith.constant 0 : index
    %9 = vector.load %arg2[%c0_2, %c0_3] : memref<128x128xf32, #tpu.memory_space<vmem>>, vector<128x128xf32>
    %cst = arith.constant dense<0.000000e+00> : vector<8x128xf32>
    %10 = tpu.matmul %8, %9, %cst {dimension_numbers = #tpu.dot_dimension_numbers<[1], [0], [0], [1], [0, 0, 1, 1], [], []>} : vector<8x128xf32>, vector<128x128xf32>, vector<8x128xf32> -> vector<8x128xf32>
    %11 = vector.broadcast %2 : f32 to vector<8x128xf32>
    %12 = arith.mulf %10, %11 : vector<8x128xf32>
    %13 = vector.broadcast %3 : f32 to vector<8x128xf32>
    %14 = arith.addf %12, %13 : vector<8x128xf32>
    %cst_4 = arith.constant 0.000000e+00 : f32
    %15 = vector.broadcast %cst_4 : f32 to vector<8x128xf32>
    %16 = arith.maximumf %14, %15 : vector<8x128xf32>
    %c0_5 = arith.constant 0 : index
    %c0_6 = arith.constant 0 : index
    %17 = vector.load %arg3[%c0_5, %c0_6] : memref<8x128xf32, #tpu.memory_space<vmem>>, vector<8x128xf32>
    tpu.vector_store %arg3[%c0_5, %c0_6], %16 {strides = array<i32>} : memref<8x128xf32, #tpu.memory_space<vmem>>, vector<8x128xf32>,
    return
  }
}

</mosaic_0001>

<bundles_post_ra>
// kernel: tpu_custom_call.1
= control target key start
LH: loop header
LB: loop body
LE: loop exit
PB: predicated region body
PF: predicated region fallthrough
CT: control target
= control target key end

     0   :  { %8 = vsyncpa [#allocation5], 0  ;;  %s267_s0 = inlined_call_operand.hbm [shape: f32[4], index: 0, kind: input, shape index: {}]   ;;  %s268_s1 = inlined_call_operand.hbm [shape: f32[8,128], index: 1, kind: input, shape index: {}]   ;;  %s269_s2 = inlined_call_operand.hbm [shape: f32[128,128], index: 2, kind: input, shape index: {}]   ;;  %s270_s3 = inlined_call_operand.hbm [shape: f32[8,128], index: 3, kind: output, shape index: {}]  }
   0x1   :  { %9 = vsyncpa [#allocation3], 0 }
   0x2   :  { %10 = vsyncpa [#allocation8], 0 }
   0x3   :  { %11 = vsyncpa [#allocation4], 0  ;;  %s17_s14 = sshll.u32 %s267_s0, 4  ;;  %s26_s17 = sshll.u32 %s268_s1, 4  ;;  %s18_s14 = int_to_ptr.hbm [resolvable:$true] %s17_s14  ;;  %s27_s17 = int_to_ptr.hbm [resolvable:$true] %s26_s17 }
   0x4   :  { %s229_s18 = smov [#allocation2]   ;;  %s230_s19 = smov [#allocation6]  }
   0x5   :  { %20 = dma.hbm_to_smem %s18_s14, 16, %s229_s18, [#allocation5]  }
   0x6   :  { %s28_s20 = sshll.u32 %s230_s19, 4  ;;  %s36_s23 = sshll.u32 %s269_s2, 4  ;;  %s29_s20 = int_to_ptr.vmem [resolvable:$true] %s28_s20  ;;  %s37_s23 = int_to_ptr.hbm [resolvable:$true] %s36_s23 }
   0x7   :  { %31 = dma.hbm_to_vmem [thread:$0]  %s27_s17, 128, %s29_s20, [#allocation3]  }
   0x8   :  { %s231_s24 = smov [#allocation7]   ;;  %s232_s0 = smov 128  }
   0x9   :  { %s38_s25 = sshll.u32 %s231_s24, 4  ;;  %s233_s26 = smov 8   ;;  %s39_s25 = int_to_ptr.vmem [resolvable:$true] %s38_s25 }
   0xa   :  { %44 = dma.hbm_to_vmem [thread:$0]  %s37_s23, 2048, %s39_s25, [#allocation8], %s232_s0, %s232_s0, %s233_s26  }
   0xb   :  { %221 = dma.done.wait [#allocation5], 16  }
   0xc   :  { %222 = vsyncadd [#allocation5], 4294967280 }
   0xd   :  { %223 = dma.done.wait [#allocation3], 128  }
   0xe   :  { %224 = vsyncadd [#allocation3], 4294967168 }
   0xf   :  { %225 = dma.done.wait [#allocation8], 2048  }
  0x10   :  { %226 = vsyncadd [#allocation8], 4294965248 }
  0x11   :  { %57 = sfence }
  0x12   :  { %v82_v0 = vld [vmem:[#allocation7 + $0x78] sm:$0xff]  ;;  %v81_v1 = vld [vmem:[#allocation7 + $0x70] sm:$0xff]  ;;  %v80_v2 = vld [vmem:[#allocation7 + $0x68] sm:$0xff]  ;;  %s58_s1 = sld [smem:[#allocation2]]  ;;  %s234_s29 = smov [#allocation9]  }
  0x13   :  { %83 = vmatpush.msra.mxu0 %v82_v0  ;;  %v79_v3 = vld [vmem:[#allocation7 + $0x60] sm:$0xff]  ;;  %v78_v4 = vld [vmem:[#allocation7 + $0x58] sm:$0xff]  ;;  %v77_v5 = vld [vmem:[#allocation7 + $0x50] sm:$0xff]  ;;  %s128_s2 = sld [smem:[#allocation2 + $0x1]]  ;;  %s114_s30 = sshll.u32 %s234_s29, 4  ;;  %s115_s30 = int_to_ptr.vmem [resolvable:$true] %s114_s30 }
  0x14   :  { %v76_v6 = vld [vmem:[#allocation7 + $0x48] sm:$0xff]  ;;  %v75_v7 = vld [vmem:[#allocation7 + $0x40] sm:$0xff]  ;;  %v74_v8 = vld [vmem:[#allocation7 + $0x38] sm:$0xff]  ;;  %s129_s27 = sld [smem:[#allocation2 + $0x2]]  ;;  %s116_s6 = sshll.u32 %s270_s3, 4  ;;  %s117_s6 = int_to_ptr.hbm [resolvable:$true] %s116_s6 }
  0x15   :  { %84 = vmatpush.msra.mxu0 %v81_v1  ;;  %v73_v9 = vld [vmem:[#allocation7 + $0x30] sm:$0xff]  ;;  %v72_v10 = vld [vmem:[#allocation7 + $0x28] sm:$0xff]  ;;  %v71_v11 = vld [vmem:[#allocation7 + $0x20] sm:$0xff]  ;;  %s130_s28 = sld [smem:[#allocation2 + $0x3]] }
  0x16   :  { %v62_v12 = vld [vmem:[#allocation6] sm:$0xff]  ;;  %v69_v15 = vld [vmem:[#allocation7 + $0x10] sm:$0xff]  ;;  %v68_v18 = vld [vmem:[#allocation7 + $0x8] sm:$0xff] }
  0x17   :  { %85 = vmatpush.msra.mxu0 %v80_v2  ;;  %v70_v14 = vld [vmem:[#allocation7 + $0x18] sm:$0xff]  ;;  %v67_v19 = vld [vmem:[#allocation7] sm:$0xff] }
  0x18   :  { %v63_v13 = vstv %s58_s1 }
  0x19   :  { %86 = vmatpush.msra.mxu0 %v79_v3  ;;  %v64_v16 = vmul.f32 %v63_v13, %v62_v12  ;;  %v65_v17 = vstv %s128_s2 }
  0x1a   :  { %v103_v21 = vstv %s129_s27 }
  0x1b   :  { %87 = vmatpush.msra.mxu0 %v78_v4  ;;  %v66_v20 = vadd.f32 %v65_v17, %v64_v16  ;;  %v105_v23 = vstv %s130_s28 }
  0x1d   :  { %88 = vmatpush.msra.mxu0 %v77_v5 }
  0x1f   :  { %89 = vmatpush.msra.mxu0 %v76_v6 }
  0x21   :  { %90 = vmatpush.msra.mxu0 %v75_v7 }
  0x23   :  { %91 = vmatpush.msra.mxu0 %v74_v8 }
  0x25   :  { %92 = vmatpush.msra.mxu0 %v73_v9 }
  0x27   :  { %93 = vmatpush.msra.mxu0 %v72_v10 }
  0x29   :  { %94 = vmatpush.msra.mxu0 %v71_v11 }
  0x2b   :  { %95 = vmatpush.msra.mxu0 %v70_v14 }
  0x2d   :  { %96 = vmatpush.msra.mxu0 %v69_v15 }
  0x2f   :  { %97 = vmatpush.msra.mxu0 %v68_v18 }
  0x31   :  { %98 = vmatpush.msra.mxu0 %v67_v19 }
  0x32   :  { %99 = vmatmul.f32.vlgmr.msra.gmra.mxu0 %v66_v20 }
  0xaf   :  { %v100_v22 = vpop.f32.mrf.mxu0 }
  0xb0   :  { %v104_v24 = vmul.f32 %v103_v21, %v100_v22 }
  0xb2   :  { %v106_v25 = vadd.f32 %v105_v23, %v104_v24 }
  0xb4   :  { %v107_v26 = vmax.f32 %v106_v25, 0.0 }
  0xb6   :  { %108 = vst [vmem:[#allocation9] sm:$0xff] %v107_v26 }
  0xb7   :  { %119 = dma.vmem_to_hbm [thread:$0]  %s115_s30, 128, %s117_s6, [#allocation4]  }
  0xb8   :  { %227 = dma.done.wait [#allocation4], 128  }
  0xb9   :  { %228 = vsyncadd [#allocation4], 4294967168 }
  0xba   :  { %124 = vsyncpa [#allocation3], 1 }
  0xbb   :  { %125 = vsyncpa [#allocation8], 1 }
  0xbc   :  { %126 = vsyncpa [#allocation4], 1 }
  0xbd   :  { %127 = vsyncpa [#allocation5], 1 }

</bundles_post_ra>
